<compile_context>
chip_gen: v7x
topology: tpu7x:2x2x1
jax: 0.10.0
libtpu: 0.0.40
codegen_flags: <defaults>
</compile_context>

<pallas_src>
import functools

import jax
import jax.numpy as jnp
import numpy as np
from jax import lax
from jax.experimental import pallas as pl
from jax.experimental.pallas import tpu as pltpu


# ---------------------------------------------------------------------------
# Block-size selection.
# ---------------------------------------------------------------------------
def _pick_blocks(B, C, HW, itemsize, target_bytes=2 << 20):
    """Choose (b_blk, c_blk) so each feat block (b_blk, c_blk, HW) is ~target_bytes.

    c_blk is either C (full) or a multiple of 8 dividing C, keeping the last-two
    block dims layout friendly; b_blk divides B.  H*W is never split (the
    roll-based stencil needs the full plane in-block).
    """
    plane = C * HW * itemsize                       # one batch, all channels
    if plane > target_bytes:
        fitting = [d for d in range(8, C, 8)
                   if C % d == 0 and d * HW * itemsize <= target_bytes]
        c_blk = max(fitting) if fitting else C
        # TODO(synk): if C has no fitting multiple-of-8 divisor we fall back to
        # the whole channel dim; raise vmem_limit_bytes if that ever trips.
        return 1, c_blk
    b_blk = 1
    for d in range(1, B + 1):
        if B % d == 0 and d * plane <= target_bytes:
            b_blk = d
    return b_blk, C


# ---------------------------------------------------------------------------
# Kernel.
# ---------------------------------------------------------------------------
def _make_kernel(H, W, eps, use_edges):
    HW = H * W

    def kernel(*refs):
        if use_edges:
            feat_ref, img_ref, grad_ref, part_ref = refs
        else:
            feat_ref, grad_ref, part_ref = refs

        feat = feat_ref[...].astype(jnp.float32)            # (b_blk, c_blk, HW)

        # Hoisted masks, shared by the feat and img gradient paths.
        flat = lax.broadcasted_iota(jnp.int32, (1, 1, HW), 2)
        col_ok = (flat % W) < (W - 1)                       # not last image column
        row_ok = flat < (H - 1) * W                         # not last image row

        def abs_grads(x):
            # Neighbours via circular roll on the flattened H*W lane axis; the
            # wrapped / cross-row entries land only on masked positions.
            nxt_x = pltpu.roll(x, shift=HW - 1, axis=2)     # x[..., j + 1]
            nxt_y = pltpu.roll(x, shift=HW - W, axis=2)     # x[..., j + W]
            dx = jnp.where(col_ok, jnp.abs(x - nxt_x), 0.0)
            dy = jnp.where(row_ok, jnp.abs(x - nxt_y), 0.0)
            return dx, dy

        dx, dy = abs_grads(feat)

        # feat_grad = sqrt(clamp(dx^2 + dy^2, min=eps))
        grad_ref[...] = jnp.sqrt(
            jnp.maximum(dx * dx + dy * dy, eps)).astype(grad_ref.dtype)

        if use_edges:
            img = img_ref[...].astype(jnp.float32)          # (b_blk, 3, HW)
            idx, idy = abs_grads(img)
            wx = jnp.exp(-jnp.mean(idx, axis=1, keepdims=True))   # (b_blk,1,HW)
            wy = jnp.exp(-jnp.mean(idy, axis=1, keepdims=True))
            s = dx * wx + dy * wy
        else:
            s = dx + dy

        # Per-block partial loss sum as a lane-dense (8,128) tile: keeps every
        # grid axis "parallel"; the wrapper finishes the (tiny) reduction.
        part_ref[...] = jnp.broadcast_to(jnp.sum(s), (1, 1, 8, 128))

    return kernel


# ---------------------------------------------------------------------------
# Wrapper.
# ---------------------------------------------------------------------------
def feat_peak_reg(feat, img=None, *, use_edges=False):
    """FeatPeakReg.forward: returns (loss scalar, {'feat_grad': (b, c, h, w)})."""
    B, C, H, W = feat.shape
    HW = H * W
    eps = float(jnp.finfo(feat.dtype).eps)           # matches torch ops.eps(feat)

    b_blk, c_blk = _pick_blocks(B, C, HW, jnp.dtype(feat.dtype).itemsize)
    grid = (B // b_blk, C // c_blk)

    feat2 = feat.reshape(B, C, HW)                   # lane-dense layout
    in_specs = [pl.BlockSpec((b_blk, c_blk, HW), lambda b, c: (b, c, 0))]
    args = [feat2]
    if use_edges:
        ci = img.shape[1]
        img2 = img.reshape(B, ci, HW)
        in_specs.append(pl.BlockSpec((b_blk, ci, HW), lambda b, c: (b, 0, 0)))
        args.append(img2)

    kernel = _make_kernel(H, W, eps, use_edges)

    grad, parts = pl.pallas_call(
        kernel,
        grid=grid,
        in_specs=in_specs,
        out_shape=(
            jax.ShapeDtypeStruct((B, C, HW), feat.dtype),                 # feat_grad
            jax.ShapeDtypeStruct((grid[0], grid[1], 8, 128), jnp.float32),  # loss partials
        ),
        out_specs=(
            pl.BlockSpec((b_blk, c_blk, HW), lambda b, c: (b, c, 0)),
            pl.BlockSpec((1, 1, 8, 128), lambda b, c: (b, c, 0, 0)),
        ),
        compiler_params=pltpu.CompilerParams(
            dimension_semantics=("parallel", "parallel"),
            vmem_limit_bytes=32 * 1024 * 1024,
        ),
    )(*args)

    loss = -(jnp.sum(parts[:, :, 0, 0]) / float(feat.size))
    return loss, {"feat_grad": grad.reshape(B, C, H, W)}


# ---------------------------------------------------------------------------
# Pure-JAX reference (mirrors the PyTorch code) for verification.
# ---------------------------------------------------------------------------
def _ref(feat, img, *, use_edges=False):
    def grads(x, ch_mean=False):
        dx = jnp.abs(x[..., :, :-1] - x[..., :, 1:])
        dx = jnp.pad(dx, ((0, 0), (0, 0), (0, 0), (0, 1)))
        dy = jnp.abs(x[..., :-1, :] - x[..., 1:, :])
        dy = jnp.pad(dy, ((0, 0), (0, 0), (0, 1), (0, 0)))
        if ch_mean:
            dx = dx.mean(axis=1, keepdims=True)
            dy = dy.mean(axis=1, keepdims=True)
        return dx, dy

    dx, dy = grads(feat)
    eps = jnp.finfo(feat.dtype).eps
    fg = jnp.sqrt(jnp.maximum(dx**2 + dy**2, eps))
    if use_edges:
        idx, idy = grads(img, ch_mean=True)
        dx = dx * jnp.exp(-idx)
        dy = dy * jnp.exp(-idy)
    loss = -(dx.mean() + dy.mean())
    return loss, fg


if __name__ == "__main__":
    key = jax.random.PRNGKey(0)
    kf, ki = jax.random.split(key)

    B, C, H, W = 2, 4, 16, 16
    feat = jax.random.normal(kf, (B, C, H, W), dtype=jnp.float32)
    img = jax.random.uniform(ki, (B, 3, H, W), dtype=jnp.float32)

    ok = True
    for use_edges in (False, True):
        loss, aux = feat_peak_reg(feat, img, use_edges=use_edges)
        loss = jax.block_until_ready(loss)
        grad = jax.block_until_ready(aux["feat_grad"])

        ref_loss, ref_grad = _ref(feat, img, use_edges=use_edges)
        ok &= bool(np.allclose(np.asarray(loss), np.asarray(ref_loss), rtol=1e-5, atol=1e-6))
        ok &= bool(np.allclose(np.asarray(grad), np.asarray(ref_grad), rtol=1e-5, atol=1e-6))

    if ok:
        print("KERNEL_OK")
    else:
        print("KERNEL_MISMATCH")
</pallas_src>

<mosaic_0001>
module attributes {stable_mosaic.version = 11 : i64} {
  func.func @kernel(%arg0: i32, %arg1: i32, %arg2: memref<2x4x256xf32, #tpu.memory_space<vmem>>, %arg3: memref<2x4x256xf32, #tpu.memory_space<vmem>>, %arg4: memref<1x1x8x128xf32, #tpu.memory_space<vmem>>) attributes {dimension_semantics = [#tpu.dimension_semantics<parallel>, #tpu.dimension_semantics<parallel>], iteration_bounds = array<i64: 1, 1>, scalar_prefetch = 0 : i64, scratch_operands = 0 : i64, tpu.core_type = #tpu.core_type<tc>, window_params = [{transform_indices = @transform_0, window_bounds = array<i64: 2, 4, 256>}, {transform_indices = @transform_1, window_bounds = array<i64: 2, 4, 256>}, {transform_indices = @transform_2, window_bounds = array<i64: 1, 1, 8, 128>}]} {
    %c0 = arith.constant 0 : index
    %c0_0 = arith.constant 0 : index
    %c0_1 = arith.constant 0 : index
    %0 = vector.load %arg2[%c0, %c0_0, %c0_1] : memref<2x4x256xf32, #tpu.memory_space<vmem>>, vector<2x4x256xf32>
    %1 = tpu.iota {dimensions = array<i32: 2>} : vector<1x1x256xi32>
    %c16_i32 = arith.constant 16 : i32
    %c0_i32 = arith.constant 0 : i32
    %2 = arith.cmpi eq, %c16_i32, %c0_i32 : i32
    %c1_i32 = arith.constant 1 : i32
    %3 = arith.select %2, %c1_i32, %c16_i32 : i32
    %4 = vector.broadcast %3 : i32 to vector<1x1x256xi32>
    %5 = arith.remsi %1, %4 : vector<1x1x256xi32>
    %c0_i32_2 = arith.constant 0 : i32
    %6 = vector.broadcast %c0_i32_2 : i32 to vector<1x1x256xi32>
    %7 = arith.cmpi ne, %5, %6 : vector<1x1x256xi32>
    %c0_i32_3 = arith.constant 0 : i32
    %8 = vector.broadcast %c0_i32_3 : i32 to vector<1x1x256xi32>
    %9 = arith.cmpi slt, %5, %8 : vector<1x1x256xi32>
    %c0_i32_4 = arith.constant 0 : i32
    %10 = arith.cmpi slt, %3, %c0_i32_4 : i32
    %11 = vector.broadcast %10 : i1 to vector<1x1x256xi1>
    %12 = vector.broadcast %11 : vector<1x1x256xi1> to vector<1x1x256xi1>
    %13 = arith.xori %9, %12 : vector<1x1x256xi1>
    %14 = arith.andi %13, %7 : vector<1x1x256xi1>
    %15 = vector.broadcast %3 : i32 to vector<1x1x256xi32>
    %16 = arith.addi %5, %15 : vector<1x1x256xi32>
    %17 = arith.select %14, %16, %5 : vector<1x1x256xi1>, vector<1x1x256xi32>
    %c15_i32 = arith.constant 15 : i32
    %18 = vector.broadcast %c15_i32 : i32 to vector<1x1x256xi32>
    %19 = arith.cmpi slt, %17, %18 : vector<1x1x256xi32>
    %c240_i32 = arith.constant 240 : i32
    %20 = vector.broadcast %c240_i32 : i32 to vector<1x1x256xi32>
    %21 = arith.cmpi slt, %1, %20 : vector<1x1x256xi32>
    %c255_i32 = arith.constant 255 : i32
    %22 = tpu.dynamic_rotate %0 by %c255_i32 dim 2 : vector<2x4x256xf32>, i32 -> vector<2x4x256xf32>
    %c240_i32_5 = arith.constant 240 : i32
    %23 = tpu.dynamic_rotate %0 by %c240_i32_5 dim 2 : vector<2x4x256xf32>, i32 -> vector<2x4x256xf32>
    %24 = arith.subf %0, %22 : vector<2x4x256xf32>
    %25 = math.absf %24 : vector<2x4x256xf32>
    %cst = arith.constant 0.000000e+00 : f32
    %26 = vector.shape_cast %19 : vector<1x1x256xi1> to vector<1x1x256xi1>
    %27 = vector.broadcast %26 : vector<1x1x256xi1> to vector<2x4x256xi1>
    %28 = vector.broadcast %cst : f32 to vector<2x4x256xf32>
    %29 = arith.select %27, %25, %28 : vector<2x4x256xi1>, vector<2x4x256xf32>
    %30 = arith.subf %0, %23 : vector<2x4x256xf32>
    %31 = math.absf %30 : vector<2x4x256xf32>
    %cst_6 = arith.constant 0.000000e+00 : f32
    %32 = vector.shape_cast %21 : vector<1x1x256xi1> to vector<1x1x256xi1>
    %33 = vector.broadcast %32 : vector<1x1x256xi1> to vector<2x4x256xi1>
    %34 = vector.broadcast %cst_6 : f32 to vector<2x4x256xf32>
    %35 = arith.select %33, %31, %34 : vector<2x4x256xi1>, vector<2x4x256xf32>
    %36 = arith.mulf %29, %29 : vector<2x4x256xf32>
    %37 = arith.mulf %35, %35 : vector<2x4x256xf32>
    %38 = arith.addf %36, %37 : vector<2x4x256xf32>
    %cst_7 = arith.constant 1.1920929E-7 : f32
    %39 = vector.broadcast %cst_7 : f32 to vector<2x4x256xf32>
    %40 = arith.maximumf %38, %39 : vector<2x4x256xf32>
    %41 = math.sqrt %40 : vector<2x4x256xf32>
    %c0_8 = arith.constant 0 : index
    %c0_9 = arith.constant 0 : index
    %c0_10 = arith.constant 0 : index
    %42 = vector.load %arg3[%c0_8, %c0_9, %c0_10] : memref<2x4x256xf32, #tpu.memory_space<vmem>>, vector<2x4x256xf32>
    tpu.vector_store %arg3[%c0_8, %c0_9, %c0_10], %41 {strides = array<i32>} : memref<2x4x256xf32, #tpu.memory_space<vmem>>, vector<2x4x256xf32>,
    %43 = arith.addf %29, %35 : vector<2x4x256xf32>
    %44 = vector.shape_cast %43 : vector<2x4x256xf32> to vector<1x2x4x256xf32>
    %cst_11 = arith.constant dense<0.000000e+00> : vector<1xf32>
    %45 = vector.multi_reduction <add>, %44, %cst_11 [1, 2, 3] : vector<1x2x4x256xf32> to vector<1xf32>
    %46 = vector.shape_cast %45 : vector<1xf32> to vector<1x1x1x1xf32>
    %47 = vector.extract %46[0, 0, 0, 0] : f32 from vector<1x1x1x1xf32>
    %48 = vector.broadcast %47 : f32 to vector<1x1x8x128xf32>
    %c0_12 = arith.constant 0 : index
    %c0_13 = arith.constant 0 : index
    %c0_14 = arith.constant 0 : index
    %c0_15 = arith.constant 0 : index
    %49 = vector.load %arg4[%c0_12, %c0_13, %c0_14, %c0_15] : memref<1x1x8x128xf32, #tpu.memory_space<vmem>>, vector<1x1x8x128xf32>
    tpu.vector_store %arg4[%c0_12, %c0_13, %c0_14, %c0_15], %48 {strides = array<i32>} : memref<1x1x8x128xf32, #tpu.memory_space<vmem>>, vector<1x1x8x128xf32>,
    return
  }
  func.func @transform_0(%arg0: i32, %arg1: i32) -> (i32, i32, i32) {
    %c0_i32 = arith.constant 0 : i32
    %c0_i32_0 = arith.constant 0 : i32
    return %arg0, %arg1, %c0_i32 : i32, i32, i32
  }
  func.func @transform_1(%arg0: i32, %arg1: i32) -> (i32, i32, i32) {
    %c0_i32 = arith.constant 0 : i32
    %c0_i32_0 = arith.constant 0 : i32
    return %arg0, %arg1, %c0_i32 : i32, i32, i32
  }
  func.func @transform_2(%arg0: i32, %arg1: i32) -> (i32, i32, i32, i32) {
    %c0_i32 = arith.constant 0 : i32
    %c0_i32_0 = arith.constant 0 : i32
    %c0_i32_1 = arith.constant 0 : i32
    return %arg0, %arg1, %c0_i32, %c0_i32_0 : i32, i32, i32, i32
  }
}

</mosaic_0001>

<bundles_post_ra>
// kernel: tpu_custom_call.1
= control target key start
LH: loop header
LB: loop body
LE: loop exit
PB: predicated region body
PF: predicated region fallthrough
CT: control target
= control target key end

     0   :  { %8 = vsyncpa [#allocation3], 0  ;;  %s416_s0 = inlined_call_operand.hbm [shape: f32[2,4,256], index: 0, kind: input, shape index: {}]   ;;  %s417_s1 = inlined_call_operand.hbm [shape: f32[2,4,256], index: 1, kind: output, shape index: {0}]   ;;  %s418_s2 = inlined_call_operand.hbm [shape: f32[1,1,8,128], index: 2, kind: output, shape index: {1}]  }
   0x1   :  { %9 = vsyncpa [#allocation4], 0 }
   0x2   :  { %10 = vsyncpa [#allocation7], 0  ;;  %s342_s9 = smov [#allocation2]   ;;  %s270_s13 = scalar_lea.hbm %s416_s0, 256 }
   0x3   :  { %s16_s10 = sshll.u32 %s342_s9, 4  ;;  %p271_p0 = scmp.ne.s32.totalorder %s416_s0, %s270_s13  ;;  %s17_s10 = int_to_ptr.vmem [resolvable:$true] %s16_s10 }
   0x4   :  { %p274_p1 = scmp.lt.u32.totalorder %s270_s13, %s416_s0 }
   0x6   :  { %p276_p2 = pnand %p274_p1, %p271_p0 }
   0x8   :  { %279 = shalt.err (!%p276_p2)
}
   0x9   :  { %s280_s18 = scalar_lea.vmem %s17_s10, 256  ;;  %p285_p4 = scmp.lt.s32.totalorder %s17_s10, %s17_s10 }
   0xa   :  { %p281_p3 = scmp.ne.s32.totalorder %s17_s10, %s280_s18  ;;  %p286_p5 = scmp.lt.s32.totalorder %s280_s18, %s280_s18 }
   0xc   :  { %p287_p6 = por %p286_p5, %p285_p4 }
   0xe   :  { %p288_p7 = pnand %p287_p6, %p281_p3 }
  0x10   :  { %291 = shalt.err (!%p288_p7)
}
  0x11   :  { %s343_s19 = smov 128   ;;  %s344_s20 = smov 8  }
  0x12   :  { %22 = dma.hbm_to_vmem [thread:$0]  %s416_s0, 256, %s17_s10, [#allocation3], %s343_s19, %s343_s19, %s344_s20  }
  0x13   :  { %336 = dma.done.wait [#allocation3], 256  }
  0x14   :  { %337 = vsyncadd [#allocation3], 4294967040  ;;  %v26_v0 = vld [vmem:[#allocation2] sm:$0xff]  ;;  %s345_s23 = smov 112   ;;  %s346_s24 = smov 127   ;;  %v27_v2 = vld [vmem:[#allocation2 + $0x8] sm:$0xff]  ;;  %v28_v4 = vlaneseq }
  0x15   :  { %78 = vrot.lane.b32.xlu1 %v26_v0, %s345_s23  ;;  %65 = vrot.lane.b32.xlu0 %v26_v0, %s346_s24  ;;  %v61_v1 = vcombine.high %v26_v0, %v26_v0  ;;  %v62_v3 = vcombine.high %v27_v2, %v27_v2  ;;  %vm201_vm5 = vcmask 1043456   ;;  %s347_s0 = smov [#allocation5]  }
  0x16   :  { %v29_v5 = vand.u32 127, %v28_v4  ;;  %s225_s25 = sshll.u32 %s347_s0, 4  ;;  %s226_s25 = int_to_ptr.vmem [resolvable:$true] %s225_s25 }
  0x17   :  { %s292_s26 = scalar_lea.vmem %s226_s25, 256  ;;  %p297_p9 = scmp.lt.s32.totalorder %s226_s25, %s226_s25 }
  0x18   :  { %vm86_vm0 = vcmp.lt.s32.totalorder %v29_v5, 112  ;;  %vm73_vm1 = vcmp.lt.s32.totalorder %v29_v5, 127  ;;  %v35_v14 = vand.u32 15, %v29_v5  ;;  %v30_v17 = vadd.s32 128, %v29_v5  ;;  %p293_p8 = scmp.ne.s32.totalorder %s226_s25, %s292_s26  ;;  %p298_p10 = scmp.lt.s32.totalorder %s292_s26, %s292_s26 }
  0x19   :  { %67 = vrot.lane.b32.xlu0 %v27_v2, %s346_s24  ;;  %82 = vrot.lane.b32.xlu1 %v61_v1, %s345_s23 }
  0x1a   :  { %v42_v25 = vand.u32 15, %v30_v17  ;;  %vm58_vm2 = vcmp.lt.s32.totalorder %v30_v17, 240  ;;  %vm55_vm3 = vcmp.lt.s32.totalorder %v35_v14, 15  ;;  %p299_p11 = por %p298_p10, %p297_p9 }
  0x1c   :  { %vm56_vm4 = vcmp.lt.s32.totalorder %v42_v25, 15  ;;  %p300_p12 = pnand %p299_p11, %p293_p8 }
  0x1d   :  { %71 = vrot.lane.b32.xlu1 %v62_v3, %s346_s24  ;;  %69 = vrot.lane.b32.xlu0 %v61_v1, %s346_s24 }
  0x21   :  { %84 = vrot.lane.b32.xlu1 %v62_v3, %s345_s23  ;;  %80 = vrot.lane.b32.xlu0 %v27_v2, %s345_s23 }
  0x87   :  { %v79_v6 = vpop.permute.xlu1 %78  ;;  %v66_v7 = vpop.permute.xlu0 %65 }
  0x8b   :  { %v68_v8 = vpop.permute.xlu0 %67  ;;  %v83_v9 = vpop.permute.xlu1 %82 }
  0x8c   :  { %v87_v10 = vsel %vm86_vm0, %v79_v6, %v83_v9  ;;  %v89_v11 = vsel %vm86_vm0, %v83_v9, %v79_v6 }
  0x8d   :  { %v121_v12 = vcombine.low %v87_v10, %v89_v11 }
  0x8f   :  { %v125_v13 = vsub.f32 %v26_v0, %v121_v12  ;;  %v72_v15 = vpop.permute.xlu1 %71  ;;  %v70_v16 = vpop.permute.xlu0 %69 }
  0x90   :  { %v75_v18 = vsel %vm73_vm1, %v68_v8, %v72_v15  ;;  %v77_v19 = vsel %vm73_vm1, %v72_v15, %v68_v8  ;;  %v74_v20 = vsel %vm73_vm1, %v66_v7, %v70_v16  ;;  %v76_v21 = vsel %vm73_vm1, %v70_v16, %v66_v7 }
  0x91   :  { %v127_v22 = vand.u32 2147483647, %v125_v13  ;;  %v96_v23 = vcombine.low %v75_v18, %v77_v19  ;;  %v95_v24 = vcombine.low %v74_v20, %v76_v21 }
  0x93   :  { %v100_v26 = vsub.f32 %v27_v2, %v96_v23  ;;  %v99_v27 = vsub.f32 %v26_v0, %v95_v24  ;;  %v85_v28 = vpop.permute.xlu1 %84  ;;  %v81_v29 = vpop.permute.xlu0 %80  ;;  %v135_v30 = vcombine.high %v127_v22, %v127_v22  ;;  %v147_v40 = vmul.f32 %v127_v22, %v127_v22 }
  0x94   :  { %v88_v31 = vsel %vm86_vm0, %v81_v29, %v85_v28  ;;  %v90_v32 = vsel %vm86_vm0, %v85_v28, %v81_v29 }
  0x95   :  { %v102_v33 = vand.u32 2147483647, %v100_v26  ;;  %v101_v34 = vand.u32 2147483647, %v99_v27  ;;  %v122_v35 = vcombine.low %v88_v31, %v90_v32  ;;  %v140_v36 = vsel %vm58_vm2, %v135_v30, 0.0 }
  0x96   :  { %v148_v46 = vmul.f32 %v140_v36, %v140_v36 }
  0x97   :  { %v110_v37 = vcombine.high %v102_v33, %v102_v33  ;;  %v109_v38 = vcombine.high %v101_v34, %v101_v34  ;;  %v113_v39 = vsel %vm55_vm3, %v101_v34, 0.0  ;;  %v115_v41 = vsel %vm55_vm3, %v102_v33, 0.0 }
  0x98   :  { %v143_v42 = vmul.f32 %v113_v39, %v113_v39  ;;  %v126_v43 = vsub.f32 %v27_v2, %v122_v35  ;;  %v197_v44 = vadd.f32 %v127_v22, %v113_v39  ;;  %v145_v51 = vmul.f32 %v115_v41, %v115_v41 }
  0x99   :  { %v114_v45 = vsel %vm56_vm4, %v109_v38, 0.0  ;;  %v116_v49 = vsel %vm56_vm4, %v110_v37, 0.0 }
  0x9a   :  { %v151_v47 = vadd.f32 %v147_v40, %v143_v42  ;;  %v128_v48 = vand.u32 2147483647, %v126_v43  ;;  %v144_v50 = vmul.f32 %v114_v45, %v114_v45  ;;  %v198_v52 = vadd.f32 %v140_v36, %v114_v45 }
  0x9b   :  { %v146_v57 = vmul.f32 %v116_v49, %v116_v49  ;;  %v202_v59 = vsel %vm201_vm5, %v197_v44, 0.0 }
  0x9c   :  { %v155_v53 = vmax.f32 %v151_v47, 1.1920929e-07  ;;  %v149_v54 = vmul.f32 %v128_v48, %v128_v48  ;;  %v136_v55 = vcombine.high %v128_v48, %v128_v48  ;;  %v152_v56 = vadd.f32 %v148_v46, %v144_v50 }
  0x9d   :  { %v199_v58 = vadd.f32 %v128_v48, %v115_v41  ;;  %v203_v60 = vsel %vm201_vm5, %v198_v52, 0.0 }
  0x9e   :  { %v153_v61 = vadd.f32 %v149_v54, %v145_v51  ;;  %v142_v62 = vsel %vm58_vm2, %v136_v55, 0.0  ;;  %v156_v63 = vmax.f32 %v152_v56, 1.1920929e-07  ;;  %v204_v0 = vadd.f32 %v203_v60, %v202_v59 }
  0x9f   :  { %v200_v1 = vadd.f32 %v142_v62, %v116_v49  ;;  %v205_v2 = vsel %vm201_vm5, %v199_v58, 0.0  ;;  %v150_v3 = vmul.f32 %v142_v62, %v142_v62  ;;  %262 = vrsqrt.f32 %v155_v53 }
  0xa0   :  { %v157_v4 = vmax.f32 %v153_v61, 1.1920929e-07  ;;  %v206_v5 = vadd.f32 %v205_v2, %v204_v0  ;;  %264 = vrsqrt.f32 %v156_v63  ;;  %vm161_vm6 = vcmp.eq.f32.partialorder %v155_v53, inf }
  0xa1   :  { %v207_v6 = vsel %vm201_vm5, %v200_v1, 0.0  ;;  %v154_v7 = vadd.f32 %v150_v3, %v146_v57  ;;  %v164_v16 = vand.u32 2147483648, %v155_v53  ;;  %vm168_vm7 = vcmp.eq.f32.partialorder %v156_v63, inf }
  0xa2   :  { %v208_v8 = vadd.f32 %v207_v6, %v206_v5  ;;  %266 = vrsqrt.f32 %v157_v4  ;;  %v171_v17 = vand.u32 2147483648, %v156_v63  ;;  %vm163_vm8 = vcmp.eq.f32.partialorder %v155_v53, 0.0 }
  0xa3   :  { %v158_v9 = vmax.f32 %v154_v7, 1.1920929e-07  ;;  %vm170_vm9 = vcmp.eq.f32.partialorder %v156_v63, 0.0  ;;  %vm175_vm10 = vcmp.eq.f32.partialorder %v157_v4, inf  ;;  %v178_v26 = vand.u32 2147483648, %v157_v4 }
  0xa4   :  { %209 = vadd.xlane.f32.xlu0 %v208_v8  ;;  %vm177_vm12 = vcmp.eq.f32.partialorder %v157_v4, 0.0 }
  0xa5   :  { %268 = vrsqrt.f32 %v158_v9  ;;  %vm182_vm11 = vcmp.eq.f32.partialorder %v158_v9, inf  ;;  %v185_v27 = vand.u32 2147483648, %v158_v9  ;;  %vm184_vm13 = vcmp.eq.f32.partialorder %v158_v9, 0.0 }
  0xa9   :  { %v263_v10 = vpop.eup %262 }
  0xaa   :  { %v160_v11 = vmul.f32 %v263_v10, %v155_v53  ;;  %v265_v12 = vpop.eup %264 }
  0xab   :  { %v167_v14 = vmul.f32 %v265_v12, %v156_v63 }
  0xac   :  { %v162_v13 = vsel %vm161_vm6, %v155_v53, %v160_v11  ;;  %v267_v15 = vpop.eup %266 }
  0xad   :  { %v169_v18 = vsel %vm168_vm7, %v156_v63, %v167_v14  ;;  %v174_v19 = vmul.f32 %v267_v15, %v157_v4  ;;  %v165_v21 = vsel %vm163_vm8, %v164_v16, %v162_v13 }
  0xae   :  { %v172_v22 = vsel %vm170_vm9, %v171_v17, %v169_v18 }
  0xaf   :  { %v269_v20 = vpop.eup %268  ;;  %v176_v23 = vsel %vm175_vm10, %v157_v4, %v174_v19  ;;  %v191_v25 = vcombine.low %v165_v21, %v172_v22 }
  0xb0   :  { %v181_v24 = vmul.f32 %v269_v20, %v158_v9  ;;  %v179_v29 = vsel %vm177_vm12, %v178_v26, %v176_v23 }
  0xb1   :  { %195 = vst [vmem:[#allocation5] sm:$0xff] %v191_v25 }
  0xb2   :  { %v183_v28 = vsel %vm182_vm11, %v158_v9, %v181_v24 }
  0xb3   :  { %v186_v30 = vsel %vm184_vm13, %v185_v27, %v183_v28 }
  0xb4   :  { %v192_v31 = vcombine.low %v179_v29, %v186_v30 }
  0xb6   :  { %196 = vst [vmem:[#allocation5 + $0x8] sm:$0xff] %v192_v31 }
  0xb7   :  { %303 = shalt.err (!%p300_p12)
}
  0xb8   :  { %s304_s29 = scalar_lea.hbm %s417_s1, 256 }
  0xb9   :  { %p305_p13 = scmp.ne.s32.totalorder %s417_s1, %s304_s29  ;;  %p308_p0 = scmp.lt.u32.totalorder %s304_s29, %s417_s1 }
  0xbb   :  { %p310_p1 = pnand %p308_p0, %p305_p13 }
  0xbd   :  { %313 = shalt.err (!%p310_p1)
}
  0xbe   :  { %231 = dma.vmem_to_hbm [thread:$0]  %s226_s25, 256, %s417_s1, [#allocation4], %s343_s19, %s343_s19, %s344_s20  }
  0xbf   :  { %s348_s8 = smov [#allocation6]  }
  0xc0   :  { %s238_s9 = sshll.u32 %s348_s8, 4  ;;  %s239_s9 = int_to_ptr.vmem [resolvable:$true] %s238_s9 }
  0xc1   :  { %s314_s11 = scalar_lea.vmem %s239_s9, 128  ;;  %p319_p3 = scmp.lt.s32.totalorder %s239_s9, %s239_s9 }
  0xc2   :  { %p315_p2 = scmp.ne.s32.totalorder %s239_s9, %s314_s11  ;;  %p320_p4 = scmp.lt.s32.totalorder %s314_s11, %s314_s11 }
  0xc4   :  { %p321_p5 = por %p320_p4, %p319_p3 }
  0xc6   :  { %p322_p6 = pnand %p321_p5, %p315_p2 }
 0x131   :  { %v210_v32 = vpop.xlane.xlu0 %209 }
 0x132   :  { %v211_v33 = vrot.slane %v210_v32, 4 }
 0x134   :  { %v212_v34 = vadd.f32 %v211_v33, %v210_v32 }
 0x136   :  { %v213_v35 = vrot.slane %v212_v34, 2 }
 0x138   :  { %v214_v36 = vadd.f32 %v213_v35, %v212_v34 }
 0x13a   :  { %v215_v37 = vrot.slane %v214_v36, 1 }
 0x13c   :  { %v216_v38 = vadd.f32 %v215_v37, %v214_v36 }
 0x13e   :  { %251 = vpush %v216_v38 }
 0x16f   :  { %s252_s10 = spop %251 }
 0x170   :  { %v218_v39 = vstv %s252_s10 }
 0x171   :  { %219 = vst [vmem:[#allocation6] sm:$0xff] %v218_v39 }
 0x172   :  { %325 = shalt.err (!%p322_p6)
}
 0x173   :  { %s326_s13 = scalar_lea.hbm %s418_s2, 128 }
 0x174   :  { %p327_p7 = scmp.ne.s32.totalorder %s418_s2, %s326_s13  ;;  %p330_p8 = scmp.lt.u32.totalorder %s326_s13, %s418_s2 }
 0x176   :  { %p332_p9 = pnand %p330_p8, %p327_p7 }
 0x178   :  { %335 = shalt.err (!%p332_p9)
}
 0x179   :  { %241 = dma.vmem_to_hbm [thread:$0]  %s239_s9, 128, %s418_s2, [#allocation7]  }
 0x17a   :  { %338 = dma.done.wait [#allocation4], 256  }
 0x17b   :  { %339 = vsyncadd [#allocation4], 4294967040 }
 0x17c   :  { %340 = dma.done.wait [#allocation7], 128  }
 0x17d   :  { %341 = vsyncadd [#allocation7], 4294967168 }
 0x17e   :  { %248 = vsyncpa [#allocation3], 1 }
 0x17f   :  { %249 = vsyncpa [#allocation4], 1 }
 0x180   :  { %250 = vsyncpa [#allocation7], 1 }

</bundles_post_ra>
